<compile_context>
chip_gen: v5e
topology: v5e:2x2
jax: 0.10.0
libtpu: 0.0.40
codegen_flags: <defaults>
</compile_context>

<pallas_src>
import jax
import jax.numpy as jnp
from jax.experimental import pallas as pl
from jax.experimental.pallas import tpu as pltpu


def lstm_cell_kernel(x_ref, h_ref, c_ref, w_ref, b_ref, h_out_ref, c_out_ref):
    """One LSTM cell step, fully fused in VMEM.

    x_ref : (B, In)       input
    h_ref : (B, H)        previous hidden state   (aliased with h_out_ref)
    c_ref : (B, H)        previous memory cell    (aliased with c_out_ref)
    w_ref : (In + H, 4H)  fused weights; rows [0, In) = input->gates,
                          rows [In, In+H) = hidden->gates; gate order f,i,o,c
    b_ref : (1, 4H)       pre-summed bias (w_bias + u_bias) per gate
    """
    x = x_ref[...]
    h = h_ref[...]
    c = c_ref[...]

    in_size = x_ref.shape[-1]
    hidden = h_ref.shape[-1]

    # Two MXU pushes (was 8), lane-dense (B, 4H) result; single bias add.
    z = (jnp.dot(x, w_ref[0:in_size, :], preferred_element_type=jnp.float32)
         + jnp.dot(h, w_ref[in_size:in_size + hidden, :],
                   preferred_element_type=jnp.float32)
         + b_ref[...])

    # Full-width (lane-dense) EUP passes, gates sliced afterwards.
    z_sig = jax.nn.sigmoid(z)
    z_tanh = jnp.tanh(z)

    f_gate = z_sig[:, 0 * hidden:1 * hidden]
    i_gate = z_sig[:, 1 * hidden:2 * hidden]
    o_gate = z_sig[:, 2 * hidden:3 * hidden]
    c_tilde = z_tanh[:, 3 * hidden:4 * hidden]

    c_new = f_gate * c + i_gate * c_tilde
    h_new = o_gate * jnp.tanh(c_new)

    h_out_ref[...] = h_new.astype(h_out_ref.dtype)
    c_out_ref[...] = c_new.astype(c_out_ref.dtype)


@jax.jit
def lstm_cell_step(x, h, c, w, b):
    """Jitted single LSTM step: (h_new, c_new) = cell(x, h, c)."""
    B, in_size = x.shape
    H = h.shape[-1]
    itemsize = jnp.dtype(x.dtype).itemsize

    vmem = pl.BlockSpec(memory_space=pltpu.MemorySpace.VMEM)
    cost = pl.CostEstimate(
        flops=2 * B * (in_size + H) * 4 * H + 8 * B * H,
        transcendentals=9 * B * H,   # sigmoid(4H) + tanh(4H) + tanh(H) per row
        bytes_accessed=itemsize * (B * in_size          # x
                                   + 2 * B * H          # h, c in
                                   + (in_size + H) * 4 * H + 4 * H  # W, b
                                   + 2 * B * H),        # h, c out
    )

    h_new, c_new = pl.pallas_call(
        lstm_cell_kernel,
        out_shape=(jax.ShapeDtypeStruct((B, H), x.dtype),
                   jax.ShapeDtypeStruct((B, H), x.dtype)),
        in_specs=[vmem] * 5,
        out_specs=(vmem, vmem),
        input_output_aliases={1: 0, 2: 1},   # h -> h_new, c -> c_new in place
        cost_estimate=cost,
    )(x, h, c, w, b)
    return h_new, c_new


def init_lstm_params(key, input_size, hidden_size, dtype=jnp.float32):
    """Deterministic init mimicking PyTorch nn.Linear U(-1/sqrt(fan_in), ...).

    Per gate g in [f, i, o, c]:
      g_w : Linear(input_size -> hidden)  weight (H, In), bias (H,)
      g_u : Linear(hidden     -> hidden)  weight (H, H),  bias (H,)
    Returns the fused (In+H, 4H) weight, (1, 4H) pre-summed bias, and the raw
    per-gate parameters (used only by the pure-JAX reference).
    """
    keys = jax.random.split(key, 16)
    bw = 1.0 / float(input_size) ** 0.5
    bu = 1.0 / float(hidden_size) ** 0.5

    raw = {}
    gates = ("f", "i", "o", "c")
    for gi, g in enumerate(gates):
        k_w, k_wb, k_u, k_ub = keys[4 * gi:4 * gi + 4]
        raw[f"{g}_w"] = jax.random.uniform(k_w, (hidden_size, input_size),
                                           dtype, -bw, bw)
        raw[f"{g}_wb"] = jax.random.uniform(k_wb, (hidden_size,), dtype, -bw, bw)
        raw[f"{g}_u"] = jax.random.uniform(k_u, (hidden_size, hidden_size),
                                           dtype, -bu, bu)
        raw[f"{g}_ub"] = jax.random.uniform(k_ub, (hidden_size,), dtype, -bu, bu)

    # Gate-concatenated weights: lane axis is 4H (lane-dense when H == 32).
    wx = jnp.concatenate([raw[f"{g}_w"].T for g in gates], axis=1)  # (In, 4H)
    wh = jnp.concatenate([raw[f"{g}_u"].T for g in gates], axis=1)  # (H, 4H)
    w = jnp.concatenate([wx, wh], axis=0)                           # (In+H, 4H)
    b = jnp.concatenate([raw[f"{g}_wb"] + raw[f"{g}_ub"]
                         for g in gates])[None, :]                  # (1, 4H)
    return w, b, raw


class LSTMPallas:
    """Mirrors the PyTorch LSTM module: stateful single-step forward."""

    def __init__(self, input_size, hidden_size, key, dtype=jnp.float32):
        self.input_size = input_size
        self.hidden_size = hidden_size
        self.dtype = dtype
        self.w, self.b, self.raw_params = init_lstm_params(
            key, input_size, hidden_size, dtype)
        self.hidden_state = None
        self.memory_cell = None

    def __call__(self, x):
        B = x.shape[0]
        if self.hidden_state is None:
            # PyTorch uses a 1-D zeros(hidden) vector that broadcasts over the
            # batch; a (B, H) zeros buffer is numerically identical.
            self.hidden_state = jnp.zeros((B, self.hidden_size), self.dtype)
        if self.memory_cell is None:
            self.memory_cell = jnp.zeros((B, self.hidden_size), self.dtype)
        h_new, c_new = lstm_cell_step(x, self.hidden_state, self.memory_cell,
                                      self.w, self.b)
        self.hidden_state, self.memory_cell = h_new, c_new
        return self.hidden_state


def _reference_step(x, h, c, raw):
    """Pure-JAX reference mirroring the PyTorch module exactly."""
    def lin(v, wname, bname):
        return v @ raw[wname].T + raw[bname]

    f = jax.nn.sigmoid(lin(h, "f_u", "f_ub") + lin(x, "f_w", "f_wb"))
    i = jax.nn.sigmoid(lin(h, "i_u", "i_ub") + lin(x, "i_w", "i_wb"))
    o = jax.nn.sigmoid(lin(h, "o_u", "o_ub") + lin(x, "o_w", "o_wb"))
    ct = jnp.tanh(lin(h, "c_u", "c_ub") + lin(x, "c_w", "c_wb"))
    c_new = f * c + i * ct
    h_new = o * jnp.tanh(c_new)
    return h_new, c_new


if __name__ == "__main__":
    key = jax.random.PRNGKey(0)
    k_param, k_x = jax.random.split(key)

    batch, input_size, hidden_size = 8, 16, 32
    model = LSTMPallas(input_size, hidden_size, k_param)

    x = jax.random.normal(k_x, (batch, input_size), jnp.float32)

    # First forward (zero initial state), as in the PyTorch module.
    h_out = jax.block_until_ready(model(x))

    # Correctness vs pure-JAX reference built from the raw per-gate params.
    h_ref, c_ref = _reference_step(
        x,
        jnp.zeros((batch, hidden_size), jnp.float32),
        jnp.zeros((batch, hidden_size), jnp.float32),
        model.raw_params)
    assert jnp.allclose(h_out, h_ref, atol=1e-5, rtol=1e-5)
    assert jnp.allclose(model.memory_cell, c_ref, atol=1e-5, rtol=1e-5)

    # Second forward to exercise the stateful (non-zero h/c, aliased) path.
    h_out2 = jax.block_until_ready(model(x))
    h_ref2, _ = _reference_step(x, h_ref, c_ref, model.raw_params)
    assert jnp.allclose(h_out2, h_ref2, atol=1e-5, rtol=1e-5)

    print("KERNEL_OK")
</pallas_src>

<mosaic_0001>
module attributes {stable_mosaic.version = 11 : i64} {
  func.func @lstm_cell_kernel(%arg0: memref<8x16xf32, #tpu.memory_space<vmem>>, %arg1: memref<8x32xf32, #tpu.memory_space<vmem>>, %arg2: memref<8x32xf32, #tpu.memory_space<vmem>>, %arg3: memref<48x128xf32, #tpu.memory_space<vmem>>, %arg4: memref<1x128xf32, #tpu.memory_space<vmem>>, %arg5: memref<8x32xf32, #tpu.memory_space<vmem>>, %arg6: memref<8x32xf32, #tpu.memory_space<vmem>>) attributes {dimension_semantics = [], scalar_prefetch = 0 : i64, scratch_operands = 0 : i64, tpu.core_type = #tpu.core_type<tc>} {
    %c0 = arith.constant 0 : index
    %c0_0 = arith.constant 0 : index
    %0 = vector.load %arg0[%c0, %c0_0] : memref<8x16xf32, #tpu.memory_space<vmem>>, vector<8x16xf32>
    %c0_1 = arith.constant 0 : index
    %c0_2 = arith.constant 0 : index
    %1 = vector.load %arg1[%c0_1, %c0_2] : memref<8x32xf32, #tpu.memory_space<vmem>>, vector<8x32xf32>
    %c0_3 = arith.constant 0 : index
    %c0_4 = arith.constant 0 : index
    %2 = vector.load %arg2[%c0_3, %c0_4] : memref<8x32xf32, #tpu.memory_space<vmem>>, vector<8x32xf32>
    %c0_5 = arith.constant 0 : index
    %c0_6 = arith.constant 0 : index
    %3 = vector.load %arg3[%c0_5, %c0_6] : memref<48x128xf32, #tpu.memory_space<vmem>>, vector<16x128xf32>
    %cst = arith.constant dense<0.000000e+00> : vector<8x128xf32>
    %4 = tpu.matmul %0, %3, %cst {dimension_numbers = #tpu.dot_dimension_numbers<[1], [0], [0], [1], [0, 0, 1, 1], [], []>} : vector<8x16xf32>, vector<16x128xf32>, vector<8x128xf32> -> vector<8x128xf32>
    %c16 = arith.constant 16 : index
    %c0_7 = arith.constant 0 : index
    %5 = vector.load %arg3[%c16, %c0_7] : memref<48x128xf32, #tpu.memory_space<vmem>>, vector<32x128xf32>
    %cst_8 = arith.constant dense<0.000000e+00> : vector<8x128xf32>
    %6 = tpu.matmul %1, %5, %cst_8 {dimension_numbers = #tpu.dot_dimension_numbers<[1], [0], [0], [1], [0, 0, 1, 1], [], []>} : vector<8x32xf32>, vector<32x128xf32>, vector<8x128xf32> -> vector<8x128xf32>
    %7 = arith.addf %4, %6 : vector<8x128xf32>
    %c0_9 = arith.constant 0 : index
    %c0_10 = arith.constant 0 : index
    %8 = vector.load %arg4[%c0_9, %c0_10] : memref<1x128xf32, #tpu.memory_space<vmem>>, vector<1x128xf32>
    %9 = vector.broadcast %8 : vector<1x128xf32> to vector<8x128xf32>
    %10 = arith.addf %7, %9 : vector<8x128xf32>
    %11 = arith.negf %10 : vector<8x128xf32>
    %12 = math.exp %11 : vector<8x128xf32>
    %cst_11 = arith.constant 1.000000e+00 : f32
    %13 = vector.broadcast %cst_11 : f32 to vector<8x128xf32>
    %14 = arith.addf %13, %12 : vector<8x128xf32>
    %15 = arith.divf %13, %14 : vector<8x128xf32>
    %16 = math.tanh %10 : vector<8x128xf32>
    %17 = vector.extract_strided_slice %15 {offsets = [0, 0], sizes = [8, 32], strides = [1, 1]} : vector<8x128xf32> to vector<8x32xf32>
    %18 = vector.extract_strided_slice %15 {offsets = [0, 32], sizes = [8, 32], strides = [1, 1]} : vector<8x128xf32> to vector<8x32xf32>
    %19 = vector.extract_strided_slice %15 {offsets = [0, 64], sizes = [8, 32], strides = [1, 1]} : vector<8x128xf32> to vector<8x32xf32>
    %20 = vector.extract_strided_slice %16 {offsets = [0, 96], sizes = [8, 32], strides = [1, 1]} : vector<8x128xf32> to vector<8x32xf32>
    %21 = arith.mulf %17, %2 : vector<8x32xf32>
    %22 = arith.mulf %18, %20 : vector<8x32xf32>
    %23 = arith.addf %21, %22 : vector<8x32xf32>
    %24 = math.tanh %23 : vector<8x32xf32>
    %25 = arith.mulf %19, %24 : vector<8x32xf32>
    %c0_12 = arith.constant 0 : index
    %c0_13 = arith.constant 0 : index
    %26 = vector.load %arg5[%c0_12, %c0_13] : memref<8x32xf32, #tpu.memory_space<vmem>>, vector<8x32xf32>
    tpu.vector_store %arg5[%c0_12, %c0_13], %25 {strides = array<i32>} : memref<8x32xf32, #tpu.memory_space<vmem>>, vector<8x32xf32>,
    %c0_14 = arith.constant 0 : index
    %c0_15 = arith.constant 0 : index
    %27 = vector.load %arg6[%c0_14, %c0_15] : memref<8x32xf32, #tpu.memory_space<vmem>>, vector<8x32xf32>
    tpu.vector_store %arg6[%c0_14, %c0_15], %23 {strides = array<i32>} : memref<8x32xf32, #tpu.memory_space<vmem>>, vector<8x32xf32>,
    return
  }
}

</mosaic_0001>

<bundles_post_ra>
// kernel: lstm_cell_step.1
= control target key start
LH: loop header
LB: loop body
LE: loop exit
PB: predicated region body
PF: predicated region fallthrough
CT: control target
= control target key end

     0   :  { %12 = vsyncpa [#allocation3], 0  ;;  %s426_s0 = inlined_call_operand.vmem [shape: f32[8,16], index: 0, kind: input, shape index: {}]   ;;  %s427_s1 = inlined_call_operand.hbm [shape: f32[8,32], index: 1, kind: input, shape index: {}, may-alias: {1,5}]   ;;  %s428_s2 = inlined_call_operand.hbm [shape: f32[8,32], index: 2, kind: input, shape index: {}, may-alias: {2,6}]   ;;  %s429_s3 = inlined_call_operand.hbm [shape: f32[48,128], index: 3, kind: input, shape index: {}]   ;;  %s430_s4 = inlined_call_operand.vmem [shape: f32[1,128], index: 4, kind: input, shape index: {}]   ;;  %s431_s5 = inlined_call_operand.hbm [shape: f32[8,32], index: 5, kind: output, shape index: {0}, may-alias: {1,5}]   ;;  %s432_s6 = inlined_call_operand.hbm [shape: f32[8,32], index: 6, kind: output, shape index: {1}, may-alias: {2,6}]  }
   0x1   :  { %13 = vsyncpa [#allocation6], 0 }
   0x2   :  { %14 = vsyncpa [#allocation4], 0  ;;  %s34_s23 = sshll.u32 %s428_s2, 4  ;;  %s35_s23 = int_to_ptr.hbm [resolvable:$true] %s34_s23 }
   0x3   :  { %15 = vsyncpa [#allocation10], 0  ;;  %s355_s24 = smov [#allocation5]   ;;  %s23_s28 = sshll.u32 %s427_s1, 4  ;;  %s24_s28 = int_to_ptr.hbm [resolvable:$true] %s23_s28 }
   0x4   :  { %s36_s25 = sshll.u32 %s355_s24, 4  ;;  %s356_s29 = smov [#allocation2]   ;;  %s37_s25 = int_to_ptr.vmem [resolvable:$true] %s36_s25 }
   0x5   :  { %39 = dma.hbm_to_vmem [thread:$0]  %s35_s23, 128, %s37_s25, [#allocation6]  }
   0x6   :  { %s25_s30 = sshll.u32 %s356_s29, 4  ;;  %s44_s9 = sshll.u32 %s429_s3, 4  ;;  %s26_s30 = int_to_ptr.vmem [resolvable:$true] %s25_s30  ;;  %s45_s9 = int_to_ptr.hbm [resolvable:$true] %s44_s9 }
   0x7   :  { %28 = dma.hbm_to_vmem [thread:$0]  %s24_s28, 128, %s26_s30, [#allocation3]  }
   0x8   :  { %s357_s2 = smov [#allocation7]   ;;  %s358_s11 = smov 128  }
   0x9   :  { %s46_s10 = sshll.u32 %s357_s2, 4  ;;  %s359_s12 = smov 8   ;;  %s47_s10 = int_to_ptr.vmem [resolvable:$true] %s46_s10 }
   0xa   :  { %52 = dma.hbm_to_vmem [thread:$0]  %s45_s9, 768, %s47_s10, [#allocation6], %s358_s11, %s358_s11, %s359_s12  }
   0xb   :  { %347 = dma.done.wait [#allocation3], 128  }
   0xc   :  { %348 = vsyncadd [#allocation3], 4294967168 }
   0xd   :  { %349 = dma.done.wait [#allocation6], 896  }
   0xe   :  { %350 = vsyncadd [#allocation6], 4294966400  ;;  %v75_v0 = vld [vmem:[#allocation7 + $0x28] sm:$0xff]  ;;  %v74_v1 = vld [vmem:[#allocation7 + $0x20] sm:$0xff]  ;;  %vm100_vm0 = vcmask 130048   ;;  %vm76_vm1 = vcmask 261120  }
   0xf   :  { %92 = vmatpush.msra.mxu0 %v75_v0  ;;  %v71_v2 = vld [vmem:[#allocation7 + $0x8] sm:$0xff]  ;;  %v70_v3 = vld [vmem:[#allocation7] sm:$0xff]  ;;  %v73_v4 = vld [vmem:[#allocation7 + $0x18] sm:$0xff]  ;;  %s362_s15 = smov [#allocation9]   ;;  %s190_s19 = sshll.u32 %s432_s6, 4  ;;  %s191_s19 = int_to_ptr.hbm [resolvable:$true] %s190_s19 }
  0x10   :  { %118 = vmatpush.msra.mxu1 %v71_v2  ;;  %v67_v5 = vld [vmem:[%s426_s0] sm:$0xff]  ;;  %s360_s0 = smov 64   ;;  %v69_v29 = vld [vmem:[#allocation5] sm:$0xff]  ;;  %s188_s16 = sshll.u32 %s362_s15, 4  ;;  %s189_s16 = int_to_ptr.vmem [resolvable:$true] %s188_s16 }
  0x11   :  { %93 = vmatpush.msra.mxu0 %v74_v1  ;;  %v72_v6 = vld [vmem:[#allocation7 + $0x10] sm:$0xff]  ;;  %s363_s20 = smov [#allocation8]   ;;  %s179_s24 = sshll.u32 %s431_s5, 4  ;;  %s180_s24 = int_to_ptr.hbm [resolvable:$true] %s179_s24 }
  0x12   :  { %119 = vmatpush.msra.mxu1 %v70_v3  ;;  %v68_v7 = vld [vmem:[#allocation2] sm:$0xff]  ;;  %s177_s21 = sshll.u32 %s363_s20, 4  ;;  %s178_s21 = int_to_ptr.vmem [resolvable:$true] %s177_s21 }
  0x13   :  { %94 = vmatpush.msra.mxu0 %v73_v4  ;;  %207 = vmatmul.msk.f32.vlgmr.msra.gmra.mxu1 %vm100_vm0, %v67_v5  ;;  %v218_v9 = vld [vmem:[%s430_s4] ss:$0 sm:$0xff]  ;;  %s361_s4 = smov 96  }
  0x15   :  { %95 = vmatpush.msra.mxu0 %v72_v6 }
  0x16   :  { %206 = vmatmul.msk.f32.vlgmr.msra.gmra.mxu0 %vm76_vm1, %v68_v7 }
  0x90   :  { %v121_v8 = vpop.f32.mrf.mxu1 }
  0x93   :  { %v97_v10 = vpop.f32.mrf.mxu0 }
  0x94   :  { %v122_v11 = vadd.f32 %v121_v8, %v97_v10 }
  0x96   :  { %v128_v12 = vadd.f32 %v218_v9, %v122_v11 }
  0x98   :  { %219 = vtanh.f32 %v128_v12  ;;  %v208_v14 = vmul.f32 -1.442695, %v128_v12 }
  0x9a   :  { %221 = vpow2.f32 %v208_v14 }
  0x9e   :  { %v220_v13 = vpop.eup %219 }
  0x9f   :  { %151 = vrot.lane.b32.xlu0 %v220_v13, %s360_s0 }
  0xa0   :  { %v222_v15 = vpop.eup %221 }
  0xa1   :  { %v132_v16 = vadd.f32 1.0, %v222_v15 }
  0xa3   :  { %223 = vrcp.f32 %v132_v16  ;;  %v144_v22 = vand.u32 2147483648, %v132_v16  ;;  %vm138_vm3 = vweird.f32 %v132_v16  ;;  %v142_v23 = vand.u32 2147483647, %v132_v16 }
  0xa5   :  { %v145_v25 = vor.u32 1.1754944e-38, %v144_v22  ;;  %vm143_vm5 = vcmp.eq.f32.partialorder %v142_v23, 8.507059e+37 }
  0xa9   :  { %v224_v17 = vpop.eup %223 }
  0xaa   :  { %v134_v18 = vmul.f32 %v224_v17, %v132_v16  ;;  %vm139_vm2 = vweird.f32 %v224_v17 }
  0xab   :  { %vm140_vm4 = vmor %vm138_vm3, %vm139_vm2 }
  0xac   :  { %v135_v19 = vsub.f32 1.0, %v134_v18 }
  0xae   :  { %v136_v20 = vmul.f32 %v224_v17, %v135_v19 }
  0xb0   :  { %v137_v21 = vadd.f32 %v224_v17, %v136_v20 }
  0xb2   :  { %v141_v24 = vsel %vm140_vm4, %v224_v17, %v137_v21 }
  0xb3   :  { %v146_v27 = vsel %vm143_vm5, %v145_v25, %v141_v24 }
  0xb4   :  { %v149_v30 = vmul.f32 %v146_v27, %v69_v29 }
 0x111   :  { %v152_v26 = vpop.permute.xlu0 %151 }
 0x112   :  { %v154_v28 = vmul.f32 %v152_v26, %v146_v27 }
 0x114   :  { %156 = vrot.lane.b32.xlu0 %v154_v28, %s361_s4 }
 0x186   :  { %v157_v31 = vpop.permute.xlu0 %156 }
 0x187   :  { %v159_v32 = vadd.f32 %v157_v31, %v149_v30 }
 0x189   :  { %225 = vtanh.f32 %v159_v32  ;;  %171 = vst.msk [vmem:[#allocation9] sm:$0xff] %vm76_vm1, %v159_v32 }
 0x18a   :  { %193 = dma.vmem_to_hbm [thread:$0]  %s189_s16, 128, %s191_s19, [#allocation10]  }
 0x18f   :  { %v226_v33 = vpop.eup %225 }
 0x190   :  { %162 = vrot.lane.b32.xlu1 %v226_v33, %s360_s0 }
 0x202   :  { %v163_v34 = vpop.permute.xlu1 %162 }
 0x203   :  { %v165_v35 = vmul.f32 %v163_v34, %v146_v27 }
 0x205   :  { %167 = vrot.lane.b32.xlu1 %v165_v35, %s360_s0 }
 0x277   :  { %v168_v36 = vpop.permute.xlu1 %167 }
 0x278   :  { %170 = vst.msk [vmem:[#allocation8] sm:$0xff] %vm76_vm1, %v168_v36 }
 0x279   :  { %182 = dma.vmem_to_hbm [thread:$0]  %s178_s21, 128, %s180_s24, [#allocation4]  }
 0x27a   :  { %351 = dma.done.wait [#allocation4], 128  }
 0x27b   :  { %352 = vsyncadd [#allocation4], 4294967168 }
 0x27c   :  { %353 = dma.done.wait [#allocation10], 128  }
 0x27d   :  { %354 = vsyncadd [#allocation10], 4294967168 }
 0x27e   :  { %202 = vsyncpa [#allocation3], 1 }
 0x27f   :  { %203 = vsyncpa [#allocation6], 1 }
 0x280   :  { %204 = vsyncpa [#allocation4], 1 }
 0x281   :  { %205 = vsyncpa [#allocation10], 1 }

</bundles_post_ra>
